<compile_context>
chip_gen: v7x
topology: tpu7x:2x2x1
jax: 0.10.0
libtpu: 0.0.40
codegen_flags: <defaults>
</compile_context>

<pallas_src>
import functools

import jax
import jax.numpy as jnp
from jax.experimental import pallas as pl
from jax.experimental.pallas import tpu as pltpu


def _ce_label_smooth_kernel(x_ref, t_ref, loss_ref, *,
                            epsilon: float, batch: int, num_classes: int,
                            block_b: int):
    i = pl.program_id(0)

    x = x_ref[...].astype(jnp.float32)                 # (TB, C)
    t = t_ref[...]                                     # (TB, 1) int32

    # Numerically-stable log-sum-exp along the class (lane) axis.
    m = jnp.max(x, axis=1, keepdims=True)              # (TB, 1)
    z = x - m                                          # (TB, C)
    lse = jnp.log(jnp.sum(jnp.exp(z), axis=1, keepdims=True))   # (TB, 1)

    # Single fused weighted reduction replacing the separate target-gather and
    # sum_z passes:
    #   row_contrib_b = sum_c w_bc * z_bc
    #   w_bc = (1-eps) + eps/C  if c == t_b  else  eps/C
    lo = epsilon / num_classes
    hi = (1.0 - epsilon) + lo
    class_ids = jax.lax.broadcasted_iota(jnp.int32, z.shape, 1)
    w = jnp.where(class_ids == t, hi, lo)              # (TB, C)
    row_contrib = jnp.sum(w * z, axis=1, keepdims=True)

    row_loss = lse - row_contrib                       # (TB, 1)

    # Mask padded rows of a partial last tile (select, NOT multiply, so any
    # garbage/NaN read from the padded region cannot leak).
    row_ids = i * block_b + jax.lax.broadcasted_iota(
        jnp.int32, row_loss.shape, 0)
    loss_ref[...] = jnp.where(row_ids < batch, row_loss, 0.0)


def _vmem_capacity_bytes() -> int:
    try:
        cap = int(getattr(pltpu.get_tpu_info(), "vmem_capacity_bytes"))
        if cap > 0:
            return cap
    except Exception:
        pass
    return 64 * 1024 * 1024                            # conservative (v7x per-TC)


def _tile_plan(batch: int, num_classes: int, in_itemsize: int,
               block_b: int | None):
    """Pick the batch tile and a matching scoped-VMEM limit.

    Budget is on the f32 working set: 2x double-buffered input tiles plus ~4
    f32 tile-sized temporaries (x_f32, z, exp(z), weights/iota)."""
    vmem_cap = _vmem_capacity_bytes()
    bytes_per_row = num_classes * (2 * in_itemsize + 4 * 4)

    if block_b is None:
        # <=1/4 of physical VMEM (>=50% headroom even on v7x's 64 MiB), and a
        # 16 MiB working-set ceiling: the ~0.35us per-step overhead is fully
        # hidden well before that, so bigger tiles only burn VMEM.
        budget = min(vmem_cap // 4, 16 * 1024 * 1024)
        tb = budget // max(1, bytes_per_row)
        tb = max(8, (tb // 8) * 8)                     # sublane-aligned
        if tb >= batch:
            tb = batch                                 # full-array block is legal
    else:
        tb = min(int(block_b), batch)

    working = tb * bytes_per_row
    aux = batch * 8 + (4 << 20)                        # targets + output + slack
    desired = working + aux
    vmem_limit = int(min(max(desired, 32 << 20), (vmem_cap * 3) // 4))
    return tb, vmem_limit


def cross_entropy_label_smooth(inputs: jax.Array,
                               targets: jax.Array,
                               epsilon: float,
                               block_b: int | None = None) -> jax.Array:
    """Pallas TPU implementation of CrossEntropyLabelSmooth.forward.

    inputs:  (B, C) float logits (f32 or bf16)
    targets: (B,)   int class indices
    returns: scalar float32 loss
    """
    B, C = inputs.shape
    targets2d = targets.astype(jnp.int32).reshape(B, 1)

    itemsize = jnp.dtype(inputs.dtype).itemsize
    tb, vmem_limit = _tile_plan(B, C, itemsize, block_b)
    num_tiles = pl.cdiv(B, tb)

    kernel = functools.partial(
        _ce_label_smooth_kernel,
        epsilon=float(epsilon), batch=B, num_classes=C, block_b=tb)

    # Per-row losses (padded rows written as exactly 0.0); each grid step owns
    # a disjoint output block -> no carried state -> "parallel" grid axis.
    row_losses = pl.pallas_call(
        kernel,
        out_shape=jax.ShapeDtypeStruct((num_tiles * tb, 1), jnp.float32),
        grid=(num_tiles,),
        in_specs=[
            pl.BlockSpec((tb, C), lambda i: (i, 0)),   # logits tile (VMEM)
            pl.BlockSpec((tb, 1), lambda i: (i, 0)),   # labels tile (VMEM)
        ],
        out_specs=pl.BlockSpec((tb, 1), lambda i: (i, 0)),
        compiler_params=pltpu.CompilerParams(
            dimension_semantics=("parallel",),
            vmem_limit_bytes=vmem_limit),
    )(inputs, targets2d)

    return jnp.sum(row_losses) / B


def _reference(inputs, targets, epsilon):
    # pure-JAX reference mirroring the PyTorch module
    num_classes = inputs.shape[-1]
    log_probs = jax.nn.log_softmax(inputs.astype(jnp.float32), axis=1)
    onehot = jax.nn.one_hot(targets, num_classes, dtype=jnp.float32)
    t = (1.0 - epsilon) * onehot + epsilon / num_classes
    return jnp.sum(jnp.mean(-t * log_probs, axis=0))


if __name__ == "__main__":
    epsilon = 0.1

    # Case 1: small shape, single full-array tile.
    k_x, k_t = jax.random.split(jax.random.PRNGKey(0))
    batch, num_classes = 8, 32
    inputs = jax.random.normal(k_x, (batch, num_classes), dtype=jnp.float32)
    targets = jax.random.randint(k_t, (batch,), 0, num_classes, dtype=jnp.int32)

    loss = cross_entropy_label_smooth(inputs, targets, epsilon)
    jax.block_until_ready(loss)
    ref = _reference(inputs, targets, epsilon)
    assert jnp.allclose(loss, ref, atol=1e-5, rtol=1e-5), (loss, ref)

    # Case 2: forced batch tiling with a partial last tile (exercises the
    # multi-tile parallel grid and row masking).
    k_x2, k_t2 = jax.random.split(jax.random.PRNGKey(1))
    batch2, num_classes2 = 20, 32
    inputs2 = jax.random.normal(k_x2, (batch2, num_classes2), dtype=jnp.float32)
    targets2 = jax.random.randint(
        k_t2, (batch2,), 0, num_classes2, dtype=jnp.int32)

    loss2 = cross_entropy_label_smooth(inputs2, targets2, epsilon, block_b=8)
    jax.block_until_ready(loss2)
    ref2 = _reference(inputs2, targets2, epsilon)
    assert jnp.allclose(loss2, ref2, atol=1e-5, rtol=1e-5), (loss2, ref2)

    # Case 3: bf16 logits stay bf16 in HBM (kernel upcasts to f32 internally).
    k_x3, k_t3 = jax.random.split(jax.random.PRNGKey(2))
    batch3, num_classes3 = 16, 128
    inputs3 = jax.random.normal(
        k_x3, (batch3, num_classes3), dtype=jnp.float32).astype(jnp.bfloat16)
    targets3 = jax.random.randint(
        k_t3, (batch3,), 0, num_classes3, dtype=jnp.int32)

    loss3 = cross_entropy_label_smooth(inputs3, targets3, epsilon)
    jax.block_until_ready(loss3)
    ref3 = _reference(inputs3, targets3, epsilon)
    assert jnp.allclose(loss3, ref3, atol=1e-4, rtol=1e-4), (loss3, ref3)

    print("KERNEL_OK")
</pallas_src>

<mosaic_0001>
module attributes {stable_mosaic.version = 11 : i64} {
  func.func @_ce_label_smooth_kernel(%arg0: i32, %arg1: memref<8x32xf32, #tpu.memory_space<vmem>>, %arg2: memref<8x1xi32, #tpu.memory_space<vmem>>, %arg3: memref<8x1xf32, #tpu.memory_space<vmem>>) attributes {dimension_semantics = [#tpu.dimension_semantics<parallel>], iteration_bounds = array<i64: 1>, scalar_prefetch = 0 : i64, scratch_operands = 0 : i64, tpu.core_type = #tpu.core_type<tc>, window_params = [{transform_indices = @transform_0, window_bounds = array<i64: 8, 32>}, {transform_indices = @transform_1, window_bounds = array<i64: 8, 1>}, {transform_indices = @transform_2, window_bounds = array<i64: 8, 1>}]} {
    %c0 = arith.constant 0 : index
    %c0_0 = arith.constant 0 : index
    %0 = vector.load %arg1[%c0, %c0_0] : memref<8x32xf32, #tpu.memory_space<vmem>>, vector<8x32xf32>
    %c0_1 = arith.constant 0 : index
    %c0_2 = arith.constant 0 : index
    %1 = vector.load %arg2[%c0_1, %c0_2] : memref<8x1xi32, #tpu.memory_space<vmem>>, vector<8x1xi32>
    %cst = arith.constant dense<0xFF800000> : vector<8xf32>
    %2 = vector.multi_reduction <maximumf>, %0, %cst [1] : vector<8x32xf32> to vector<8xf32>
    %3 = vector.shape_cast %2 : vector<8xf32> to vector<8x1xf32>
    %4 = vector.broadcast %3 : vector<8x1xf32> to vector<8x32xf32>
    %5 = arith.subf %0, %4 : vector<8x32xf32>
    %6 = math.exp %5 : vector<8x32xf32>
    %cst_3 = arith.constant dense<0.000000e+00> : vector<8xf32>
    %7 = vector.multi_reduction <add>, %6, %cst_3 [1] : vector<8x32xf32> to vector<8xf32>
    %8 = vector.shape_cast %7 : vector<8xf32> to vector<8x1xf32>
    %9 = math.log %8 : vector<8x1xf32>
    %10 = tpu.iota {dimensions = array<i32: 1>} : vector<8x32xi32>
    %11 = vector.broadcast %1 : vector<8x1xi32> to vector<8x32xi32>
    %12 = arith.cmpi eq, %10, %11 : vector<8x32xi32>
    %cst_4 = arith.constant 0.903124988 : f32
    %cst_5 = arith.constant 3.125000e-03 : f32
    %13 = vector.broadcast %cst_4 : f32 to vector<8x32xf32>
    %14 = vector.broadcast %cst_5 : f32 to vector<8x32xf32>
    %15 = arith.select %12, %13, %14 : vector<8x32xi1>, vector<8x32xf32>
    %16 = arith.mulf %15, %5 : vector<8x32xf32>
    %cst_6 = arith.constant dense<0.000000e+00> : vector<8xf32>
    %17 = vector.multi_reduction <add>, %16, %cst_6 [1] : vector<8x32xf32> to vector<8xf32>
    %18 = vector.shape_cast %17 : vector<8xf32> to vector<8x1xf32>
    %19 = arith.subf %9, %18 : vector<8x1xf32>
    %c8_i32 = arith.constant 8 : i32
    %20 = arith.muli %arg0, %c8_i32 : i32
    %21 = tpu.iota {dimensions = array<i32: 0>} : vector<8x1xi32>
    %22 = vector.broadcast %20 : i32 to vector<8x1xi32>
    %23 = arith.addi %22, %21 : vector<8x1xi32>
    %c8_i32_7 = arith.constant 8 : i32
    %24 = vector.broadcast %c8_i32_7 : i32 to vector<8x1xi32>
    %25 = arith.cmpi slt, %23, %24 : vector<8x1xi32>
    %cst_8 = arith.constant 0.000000e+00 : f32
    %26 = vector.broadcast %cst_8 : f32 to vector<8x1xf32>
    %27 = arith.select %25, %19, %26 : vector<8x1xi1>, vector<8x1xf32>
    %c0_9 = arith.constant 0 : index
    %c0_10 = arith.constant 0 : index
    %28 = vector.load %arg3[%c0_9, %c0_10] : memref<8x1xf32, #tpu.memory_space<vmem>>, vector<8x1xf32>
    tpu.vector_store %arg3[%c0_9, %c0_10], %27 {strides = array<i32>} : memref<8x1xf32, #tpu.memory_space<vmem>>, vector<8x1xf32>,
    return
  }
  func.func @transform_0(%arg0: i32) -> (i32, i32) {
    %c0_i32 = arith.constant 0 : i32
    %c0_i32_0 = arith.constant 0 : i32
    return %arg0, %c0_i32 : i32, i32
  }
  func.func @transform_1(%arg0: i32) -> (i32, i32) {
    %c0_i32 = arith.constant 0 : i32
    %c0_i32_0 = arith.constant 0 : i32
    return %arg0, %c0_i32 : i32, i32
  }
  func.func @transform_2(%arg0: i32) -> (i32, i32) {
    %c0_i32 = arith.constant 0 : i32
    %c0_i32_0 = arith.constant 0 : i32
    return %arg0, %c0_i32 : i32, i32
  }
}

</mosaic_0001>

<bundles_post_ra>
// kernel: tpu_custom_call.1
= control target key start
LH: loop header
LB: loop body
LE: loop exit
PB: predicated region body
PF: predicated region fallthrough
CT: control target
= control target key end

     0   :  { %vm13_vm0 = vcmask 261120   ;;  %v57_v1 = vmov 0   ;;  %v25_v6 = vlaneseq  ;;  %v58_v10 = vmov 0.003125   ;;  %s86_s0 = inlined_call_operand.vmem [shape: f32[8,32], index: 0, kind: input, shape index: {}]   ;;  %s87_s1 = inlined_call_operand.vmem [shape: s32[8,1], index: 1, kind: input, shape index: {}]   ;;  %s88_s2 = inlined_call_operand.vmem [shape: f32[8,1], index: 2, kind: output, shape index: {}]  }
   0x1   :  { %v11_v0 = vld [vmem:[%s86_s0] sm:$0xff]  ;;  %52 = vset.pattern.permute.xlu0 %v57_v1  ;;  %vm44_vm2 = vcmask 7168  }
   0x2   :  { %v14_v2 = vsel %vm13_vm0, %v11_v0, -inf  ;;  %v12_v3 = vld [vmem:[%s87_s1] sm:$0xff]  ;;  %v26_v8 = vand.u32 127, %v25_v6 }
   0x3   :  { %15 = vmax.xlane.f32.xlu0 %v14_v2 }
  0x19   :  { %28 = vperm.xlu0 %52, %v12_v3  }
  0x90   :  { %v16_v4 = vpop.xlane.xlu0 %15 }
  0x91   :  { %v17_v5 = vsub.f32 %v11_v0, %v16_v4 }
  0x93   :  { %v18_v7 = vmul.f32 1.442695, %v17_v5 }
  0x95   :  { %53 = vpow2.f32 %v18_v7 }
  0x98   :  { %v29_v9 = vpop.permute.xlu0 %28 }
  0x99   :  { %vm30_vm1 = vcmp.eq.s32.totalorder %v26_v8, %v29_v9 }
  0x9a   :  { %v31_v11 = vsel %vm30_vm1, 0.903125, %v58_v10 }
  0x9b   :  { %v32_v14 = vmul.f32 %v31_v11, %v17_v5 }
  0x9d   :  { %v33_v15 = vsel %vm13_vm0, %v32_v14, 0.0 }
  0x9f   :  { %v54_v12 = vpop.eup %53 }
  0xa0   :  { %v20_v13 = vsel %vm13_vm0, %v54_v12, 0.0 }
  0xa1   :  { %21 = vadd.xlane.f32.xlu1 %v20_v13 }
  0xa5   :  { %34 = vadd.xlane.f32.xlu1 %v33_v15 }
 0x12e   :  { %v22_v16 = vpop.xlane.xlu1 %21 }
 0x12f   :  { %55 = vlog2.f32 %v22_v16 }
 0x132   :  { %v35_v19 = vpop.xlane.xlu1 %34 }
 0x139   :  { %v56_v17 = vpop.eup %55 }
 0x13a   :  { %v24_v18 = vmul.f32 0.6931472, %v56_v17 }
 0x13c   :  { %v36_v20 = vsub.f32 %v24_v18, %v35_v19 }
 0x13e   :  { %45 = vst.msk [vmem:[%s88_s2] sm:$0xff] %vm44_vm2, %v36_v20 }

</bundles_post_ra>
